<compile_context>
chip_gen: v6e
topology: v6e:2x2x1
jax: 0.10.0
libtpu: 0.0.40
codegen_flags: <defaults>
</compile_context>

<pallas_src>
import functools

import numpy as np
import jax
import jax.numpy as jnp
from jax.experimental import pallas as pl
from jax.experimental.pallas import tpu as pltpu


# ------------------------------- Pallas kernel -------------------------------

def _fused_kernel(x_ref, coef_ref, w1_ref, b1_ref, w2p_ref, bf_ref, o_ref, *, W):
    """x (C, L) with L = N*H*W, lane order (n, h, w) -> 4 phase planes (4, C, L)."""
    x = x_ref[...]                                               # (C, L)
    L = x.shape[1]

    # Merged amp/pha layer 1 + LeakyReLU(0.1): (2C, C) @ (C, L).
    h1 = jnp.dot(w1_ref[...], x, preferred_element_type=jnp.float32) + b1_ref[...]
    h1 = jnp.where(h1 > 0, h1, 0.1 * h1)                         # (2C, L)

    # Merged layer 2 + post conv (w2p = Wpost @ [W2a|W2p]); all biases folded
    # into b_final, added before the upsample (bilinear taps sum to 1).
    t = jnp.dot(w2p_ref[...], h1, preferred_element_type=jnp.float32) + bf_ref[...]   # (C, L)

    # ---- 2x bilinear upsample (align_corners=False) as a 2-tap lane filter ----
    # coef rows: 0/1 even-col (self, prev-w), 2/3 odd-col (self, next-w),
    #            4/5 even-row (self, prev-h), 6/7 odd-row (self, next-h).
    # Edge clamping is baked into the coefficients (neighbour tap weight = 0),
    # which also zeroes any circular-wrap / cross-row / cross-batch pickup.
    c = coef_ref[...]                                            # (8, L)
    prev_w = pltpu.roll(t, 1, axis=1)                            # t[l-1]
    next_w = pltpu.roll(t, L - 1, axis=1)                        # t[l+1]
    s0 = c[0:1] * t + c[1:2] * prev_w                            # even output columns
    s1 = c[2:3] * t + c[3:4] * next_w                            # odd output columns

    def rows(u):
        prev_h = pltpu.roll(u, W, axis=1)                        # u[l-W]
        next_h = pltpu.roll(u, L - W, axis=1)                    # u[l+W]
        return c[4:5] * u + c[5:6] * prev_h, c[6:7] * u + c[7:8] * next_h

    p00, p10 = rows(s0)   # (even row, even col), (odd row, even col)
    p01, p11 = rows(s1)   # (even row, odd col),  (odd row, odd col)

    # Phase plane index = 2*dh + dw; every store is 512 lanes wide.
    o_ref[0, :, :] = p00.astype(o_ref.dtype)
    o_ref[1, :, :] = p01.astype(o_ref.dtype)
    o_ref[2, :, :] = p10.astype(o_ref.dtype)
    o_ref[3, :, :] = p11.astype(o_ref.dtype)


# ------------------------------ glue / constants ------------------------------

def _upsample_tap_coeffs(N, H, W):
    """Per-lane 2-tap coefficients for 2x bilinear (align_corners=False), lane
    order (n, h, w); edge clamp folded in by zeroing the neighbour tap."""
    L = N * H * W
    l = np.arange(L)
    w = l % W
    h = (l // W) % H
    c = np.empty((8, L), np.float32)
    c[0] = np.where(w == 0,     1.0, 0.75); c[1] = np.where(w == 0,     0.0, 0.25)
    c[2] = np.where(w == W - 1, 1.0, 0.75); c[3] = np.where(w == W - 1, 0.0, 0.25)
    c[4] = np.where(h == 0,     1.0, 0.75); c[5] = np.where(h == 0,     0.0, 0.25)
    c[6] = np.where(h == H - 1, 1.0, 0.75); c[7] = np.where(h == H - 1, 0.0, 0.25)
    return c


def init_params(key, channels):
    """Deterministic synthetic init; each conv is (Cout, Cin) weight + (Cout,) bias."""
    ks = jax.random.split(key, 10)

    def conv(kw, kb):
        w = 0.2 * jax.random.normal(kw, (channels, channels), jnp.float32)
        b = 0.05 * jax.random.normal(kb, (channels,), jnp.float32)
        return w, b

    return {
        'amp1': conv(ks[0], ks[1]), 'amp2': conv(ks[2], ks[3]),
        'pha1': conv(ks[4], ks[5]), 'pha2': conv(ks[6], ks[7]),
        'post': conv(ks[8], ks[9]),
    }


@jax.jit
def freup_pad_b_forward(x, params):
    N, C, H, W = x.shape
    L = N * H * W

    # Fold the two branches + post conv into two matmuls (wrapper-side, tiny).
    w1 = jnp.concatenate([params['amp1'][0], params['pha1'][0]], axis=0)       # (2C, C)
    b1 = jnp.concatenate([params['amp1'][1], params['pha1'][1]], axis=0)[:, None]
    w2 = jnp.concatenate([params['amp2'][0], params['pha2'][0]], axis=1)       # (C, 2C)
    b2 = params['amp2'][1] + params['pha2'][1]                                 # (C,)
    wp, bp = params['post']
    w2p = wp @ w2                                                              # (C, 2C)
    b_final = (wp @ b2 + bp)[:, None]                                          # (C, 1)

    coef = jnp.asarray(_upsample_tap_coeffs(N, H, W))                          # (8, L)

    # Batch onto the lane axis: (N,C,H,W) -> (C, N*H*W).  Tiny (8 KB) XLA transpose,
    # buys 512-lane density and a single kernel invocation (one TC on v5e/v6e).
    xk = x.reshape(N, C, H * W).transpose(1, 0, 2).reshape(C, L)

    phases = pl.pallas_call(
        functools.partial(_fused_kernel, W=W),
        out_shape=jax.ShapeDtypeStruct((4, C, L), x.dtype),
    )(xk, coef, w1, b1, w2p, b_final)

    # phases[2*dh+dw, c, (n,h,w)] -> out[n, c, 2h+dh, 2w+dw]  (32 KB XLA transpose).
    out = (phases.reshape(2, 2, C, N, H, W)
                 .transpose(3, 2, 4, 0, 5, 1)
                 .reshape(N, C, 2 * H, 2 * W))
    return out


# ------------------------------ pure-JAX reference ----------------------------

def _bilinear_upsample_matrix(size):
    """PyTorch F.interpolate(scale_factor=2, mode='bilinear', align_corners=False)
    along one axis as a (2*size, size) weight matrix (reference only)."""
    A = np.zeros((2 * size, size), dtype=np.float32)
    for q in range(2 * size):
        src = max((q + 0.5) / 2.0 - 0.5, 0.0)
        i0 = min(int(np.floor(src)), size - 1)
        i1 = min(i0 + 1, size - 1)
        f = src - i0
        A[q, i0] += 1.0 - f
        A[q, i1] += f
    return A


def reference_forward(x, params):
    def conv1x1(t, w, b):
        return jnp.einsum('nchw,oc->nohw', t, w) + b[None, :, None, None]

    def lrelu(t):
        return jnp.where(t > 0, t, 0.1 * t)

    mag = conv1x1(lrelu(conv1x1(x, *params['amp1'])), *params['amp2'])
    pha = conv1x1(lrelu(conv1x1(x, *params['pha1'])), *params['pha2'])
    s = mag + pha
    N, C, H, W = x.shape
    AH = jnp.asarray(_bilinear_upsample_matrix(H))
    AW = jnp.asarray(_bilinear_upsample_matrix(W))
    up = jnp.einsum('qh,nchw,pw->ncqp', AH, s, AW)
    return conv1x1(up, *params['post'])


if __name__ == "__main__":
    key = jax.random.PRNGKey(0)
    kx, kp = jax.random.split(key)

    N, C, H, W = 2, 4, 16, 16
    x = jax.random.normal(kx, (N, C, H, W), jnp.float32)
    params = init_params(kp, C)

    out = jax.block_until_ready(freup_pad_b_forward(x, params))
    assert out.shape == (N, C, 2 * H, 2 * W), out.shape

    ref = jax.block_until_ready(reference_forward(x, params))
    if not jnp.allclose(out, ref, atol=1e-4, rtol=1e-4):
        raise AssertionError("Pallas output does not match JAX reference")

    print("KERNEL_OK")
</pallas_src>

<mosaic_0001>
module attributes {stable_mosaic.version = 11 : i64} {
  func.func @_fused_kernel(%arg0: memref<4x512xf32, #tpu.memory_space<vmem>>, %arg1: memref<8x512xf32, #tpu.memory_space<vmem>>, %arg2: memref<8x4xf32, #tpu.memory_space<vmem>>, %arg3: memref<8x1xf32, #tpu.memory_space<vmem>>, %arg4: memref<4x8xf32, #tpu.memory_space<vmem>>, %arg5: memref<4x1xf32, #tpu.memory_space<vmem>>, %arg6: memref<4x4x512xf32, #tpu.memory_space<vmem>>) attributes {dimension_semantics = [], scalar_prefetch = 0 : i64, scratch_operands = 0 : i64, tpu.core_type = #tpu.core_type<tc>} {
    %c0 = arith.constant 0 : index
    %c0_0 = arith.constant 0 : index
    %0 = vector.load %arg0[%c0, %c0_0] : memref<4x512xf32, #tpu.memory_space<vmem>>, vector<4x512xf32>
    %c0_1 = arith.constant 0 : index
    %c0_2 = arith.constant 0 : index
    %1 = vector.load %arg2[%c0_1, %c0_2] : memref<8x4xf32, #tpu.memory_space<vmem>>, vector<8x4xf32>
    %cst = arith.constant dense<0.000000e+00> : vector<8x512xf32>
    %2 = tpu.matmul %1, %0, %cst {dimension_numbers = #tpu.dot_dimension_numbers<[1], [0], [0], [1], [0, 0, 1, 1], [], []>} : vector<8x4xf32>, vector<4x512xf32>, vector<8x512xf32> -> vector<8x512xf32>
    %c0_3 = arith.constant 0 : index
    %c0_4 = arith.constant 0 : index
    %3 = vector.load %arg3[%c0_3, %c0_4] : memref<8x1xf32, #tpu.memory_space<vmem>>, vector<8x1xf32>
    %4 = vector.broadcast %3 : vector<8x1xf32> to vector<8x512xf32>
    %5 = arith.addf %2, %4 : vector<8x512xf32>
    %cst_5 = arith.constant 0.000000e+00 : f32
    %6 = vector.broadcast %cst_5 : f32 to vector<8x512xf32>
    %7 = arith.cmpf ogt, %5, %6 : vector<8x512xf32>
    %cst_6 = arith.constant 1.000000e-01 : f32
    %8 = vector.broadcast %cst_6 : f32 to vector<8x512xf32>
    %9 = arith.mulf %8, %5 : vector<8x512xf32>
    %10 = arith.select %7, %5, %9 : vector<8x512xi1>, vector<8x512xf32>
    %c0_7 = arith.constant 0 : index
    %c0_8 = arith.constant 0 : index
    %11 = vector.load %arg4[%c0_7, %c0_8] : memref<4x8xf32, #tpu.memory_space<vmem>>, vector<4x8xf32>
    %cst_9 = arith.constant dense<0.000000e+00> : vector<4x512xf32>
    %12 = tpu.matmul %11, %10, %cst_9 {dimension_numbers = #tpu.dot_dimension_numbers<[1], [0], [0], [1], [0, 0, 1, 1], [], []>} : vector<4x8xf32>, vector<8x512xf32>, vector<4x512xf32> -> vector<4x512xf32>
    %c0_10 = arith.constant 0 : index
    %c0_11 = arith.constant 0 : index
    %13 = vector.load %arg5[%c0_10, %c0_11] : memref<4x1xf32, #tpu.memory_space<vmem>>, vector<4x1xf32>
    %14 = vector.broadcast %13 : vector<4x1xf32> to vector<4x512xf32>
    %15 = arith.addf %12, %14 : vector<4x512xf32>
    %c0_12 = arith.constant 0 : index
    %c0_13 = arith.constant 0 : index
    %16 = vector.load %arg1[%c0_12, %c0_13] : memref<8x512xf32, #tpu.memory_space<vmem>>, vector<8x512xf32>
    %c1_i32 = arith.constant 1 : i32
    %17 = tpu.dynamic_rotate %15 by %c1_i32 dim 1 : vector<4x512xf32>, i32 -> vector<4x512xf32>
    %c511_i32 = arith.constant 511 : i32
    %18 = tpu.dynamic_rotate %15 by %c511_i32 dim 1 : vector<4x512xf32>, i32 -> vector<4x512xf32>
    %19 = vector.extract_strided_slice %16 {offsets = [0, 0], sizes = [1, 512], strides = [1, 1]} : vector<8x512xf32> to vector<1x512xf32>
    %20 = vector.broadcast %19 : vector<1x512xf32> to vector<4x512xf32>
    %21 = arith.mulf %20, %15 : vector<4x512xf32>
    %22 = vector.extract_strided_slice %16 {offsets = [1, 0], sizes = [1, 512], strides = [1, 1]} : vector<8x512xf32> to vector<1x512xf32>
    %23 = vector.broadcast %22 : vector<1x512xf32> to vector<4x512xf32>
    %24 = arith.mulf %23, %17 : vector<4x512xf32>
    %25 = arith.addf %21, %24 : vector<4x512xf32>
    %26 = vector.extract_strided_slice %16 {offsets = [2, 0], sizes = [1, 512], strides = [1, 1]} : vector<8x512xf32> to vector<1x512xf32>
    %27 = vector.broadcast %26 : vector<1x512xf32> to vector<4x512xf32>
    %28 = arith.mulf %27, %15 : vector<4x512xf32>
    %29 = vector.extract_strided_slice %16 {offsets = [3, 0], sizes = [1, 512], strides = [1, 1]} : vector<8x512xf32> to vector<1x512xf32>
    %30 = vector.broadcast %29 : vector<1x512xf32> to vector<4x512xf32>
    %31 = arith.mulf %30, %18 : vector<4x512xf32>
    %32 = arith.addf %28, %31 : vector<4x512xf32>
    %c16_i32 = arith.constant 16 : i32
    %33 = tpu.dynamic_rotate %25 by %c16_i32 dim 1 : vector<4x512xf32>, i32 -> vector<4x512xf32>
    %c496_i32 = arith.constant 496 : i32
    %34 = tpu.dynamic_rotate %25 by %c496_i32 dim 1 : vector<4x512xf32>, i32 -> vector<4x512xf32>
    %35 = vector.extract_strided_slice %16 {offsets = [4, 0], sizes = [1, 512], strides = [1, 1]} : vector<8x512xf32> to vector<1x512xf32>
    %36 = vector.broadcast %35 : vector<1x512xf32> to vector<4x512xf32>
    %37 = arith.mulf %36, %25 : vector<4x512xf32>
    %38 = vector.extract_strided_slice %16 {offsets = [5, 0], sizes = [1, 512], strides = [1, 1]} : vector<8x512xf32> to vector<1x512xf32>
    %39 = vector.broadcast %38 : vector<1x512xf32> to vector<4x512xf32>
    %40 = arith.mulf %39, %33 : vector<4x512xf32>
    %41 = arith.addf %37, %40 : vector<4x512xf32>
    %42 = vector.extract_strided_slice %16 {offsets = [6, 0], sizes = [1, 512], strides = [1, 1]} : vector<8x512xf32> to vector<1x512xf32>
    %43 = vector.broadcast %42 : vector<1x512xf32> to vector<4x512xf32>
    %44 = arith.mulf %43, %25 : vector<4x512xf32>
    %45 = vector.extract_strided_slice %16 {offsets = [7, 0], sizes = [1, 512], strides = [1, 1]} : vector<8x512xf32> to vector<1x512xf32>
    %46 = vector.broadcast %45 : vector<1x512xf32> to vector<4x512xf32>
    %47 = arith.mulf %46, %34 : vector<4x512xf32>
    %48 = arith.addf %44, %47 : vector<4x512xf32>
    %c16_i32_14 = arith.constant 16 : i32
    %49 = tpu.dynamic_rotate %32 by %c16_i32_14 dim 1 : vector<4x512xf32>, i32 -> vector<4x512xf32>
    %c496_i32_15 = arith.constant 496 : i32
    %50 = tpu.dynamic_rotate %32 by %c496_i32_15 dim 1 : vector<4x512xf32>, i32 -> vector<4x512xf32>
    %51 = vector.extract_strided_slice %16 {offsets = [4, 0], sizes = [1, 512], strides = [1, 1]} : vector<8x512xf32> to vector<1x512xf32>
    %52 = vector.broadcast %51 : vector<1x512xf32> to vector<4x512xf32>
    %53 = arith.mulf %52, %32 : vector<4x512xf32>
    %54 = vector.extract_strided_slice %16 {offsets = [5, 0], sizes = [1, 512], strides = [1, 1]} : vector<8x512xf32> to vector<1x512xf32>
    %55 = vector.broadcast %54 : vector<1x512xf32> to vector<4x512xf32>
    %56 = arith.mulf %55, %49 : vector<4x512xf32>
    %57 = arith.addf %53, %56 : vector<4x512xf32>
    %58 = vector.extract_strided_slice %16 {offsets = [6, 0], sizes = [1, 512], strides = [1, 1]} : vector<8x512xf32> to vector<1x512xf32>
    %59 = vector.broadcast %58 : vector<1x512xf32> to vector<4x512xf32>
    %60 = arith.mulf %59, %32 : vector<4x512xf32>
    %61 = vector.extract_strided_slice %16 {offsets = [7, 0], sizes = [1, 512], strides = [1, 1]} : vector<8x512xf32> to vector<1x512xf32>
    %62 = vector.broadcast %61 : vector<1x512xf32> to vector<4x512xf32>
    %63 = arith.mulf %62, %50 : vector<4x512xf32>
    %64 = arith.addf %60, %63 : vector<4x512xf32>
    %c0_16 = arith.constant 0 : index
    %c0_17 = arith.constant 0 : index
    %c0_18 = arith.constant 0 : index
    %65 = vector.load %arg6[%c0_16, %c0_17, %c0_18] : memref<4x4x512xf32, #tpu.memory_space<vmem>>, vector<1x4x512xf32>
    %66 = vector.shape_cast %65 : vector<1x4x512xf32> to vector<4x512xf32>
    %67 = vector.shape_cast %41 : vector<4x512xf32> to vector<1x4x512xf32>
    tpu.vector_store %arg6[%c0_16, %c0_17, %c0_18], %67 {strides = array<i32>} : memref<4x4x512xf32, #tpu.memory_space<vmem>>, vector<1x4x512xf32>,
    %c1 = arith.constant 1 : index
    %c0_19 = arith.constant 0 : index
    %c0_20 = arith.constant 0 : index
    %68 = vector.load %arg6[%c1, %c0_19, %c0_20] : memref<4x4x512xf32, #tpu.memory_space<vmem>>, vector<1x4x512xf32>
    %69 = vector.shape_cast %68 : vector<1x4x512xf32> to vector<4x512xf32>
    %70 = vector.shape_cast %57 : vector<4x512xf32> to vector<1x4x512xf32>
    tpu.vector_store %arg6[%c1, %c0_19, %c0_20], %70 {strides = array<i32>} : memref<4x4x512xf32, #tpu.memory_space<vmem>>, vector<1x4x512xf32>,
    %c2 = arith.constant 2 : index
    %c0_21 = arith.constant 0 : index
    %c0_22 = arith.constant 0 : index
    %71 = vector.load %arg6[%c2, %c0_21, %c0_22] : memref<4x4x512xf32, #tpu.memory_space<vmem>>, vector<1x4x512xf32>
    %72 = vector.shape_cast %71 : vector<1x4x512xf32> to vector<4x512xf32>
    %73 = vector.shape_cast %48 : vector<4x512xf32> to vector<1x4x512xf32>
    tpu.vector_store %arg6[%c2, %c0_21, %c0_22], %73 {strides = array<i32>} : memref<4x4x512xf32, #tpu.memory_space<vmem>>, vector<1x4x512xf32>,
    %c3 = arith.constant 3 : index
    %c0_23 = arith.constant 0 : index
    %c0_24 = arith.constant 0 : index
    %74 = vector.load %arg6[%c3, %c0_23, %c0_24] : memref<4x4x512xf32, #tpu.memory_space<vmem>>, vector<1x4x512xf32>
    %75 = vector.shape_cast %74 : vector<1x4x512xf32> to vector<4x512xf32>
    %76 = vector.shape_cast %64 : vector<4x512xf32> to vector<1x4x512xf32>
    tpu.vector_store %arg6[%c3, %c0_23, %c0_24], %76 {strides = array<i32>} : memref<4x4x512xf32, #tpu.memory_space<vmem>>, vector<1x4x512xf32>,
    return
  }
}

</mosaic_0001>

<bundles_post_ra>
// kernel: freup_pad_b_forward.1
= control target key start
LH: loop header
LB: loop body
LE: loop exit
PB: predicated region body
PF: predicated region fallthrough
CT: control target
= control target key end

     0   :  { %vm40_vm0 = vcmask 1043456   ;;  %v708_v2 = vmov 0.0   ;;  %v709_v5 = vmov 0   ;;  %vm36_vm1 = vcmask 31744   ;;  %s713_s14 = smov 112   ;;  %s1035_s0 = inlined_call_operand.vmem [shape: f32[4,512], index: 0, kind: input, shape index: {}]   ;;  %s1036_s2 = inlined_call_operand.vmem [shape: f32[8,4], index: 2, kind: input, shape index: {}]   ;;  %s1037_s3 = inlined_call_operand.vmem [shape: f32[8,1], index: 3, kind: input, shape index: {}]   ;;  %s1038_s5 = inlined_call_operand.vmem [shape: f32[4,1], index: 5, kind: input, shape index: {}]   ;;  %s1039_s4 = inlined_call_operand.vmem [shape: f32[4,8], index: 4, kind: input, shape index: {}]   ;;  %s1040_s1 = inlined_call_operand.vmem [shape: f32[8,512], index: 1, kind: input, shape index: {}]   ;;  %s1041_s6 = inlined_call_operand.vmem [shape: f32[4,4,512], index: 6, kind: output, shape index: {}]  }
   0x1   :  { %v23_v0 = vld [vmem:[%s1035_s0] sm:$0xff]  ;;  %v24_v1 = vld [vmem:[%s1035_s0 + $0x8] sm:$0xff]  ;;  %113 = vmatprep.mubr.f32.mxu0 %v708_v2  ;;  %184 = vmatprep.mubr.f32.mxu1 %v708_v2  ;;  %vm210_vm6 = vcmask 64512   ;;  %v368_v36 = vlaneseq  ;;  %v809_v46 = vld [vmem:[%s1040_s1 + $0x18] sm:$0xff] }
   0x2   :  { %v34_v3 = vcombine.high %v23_v0, %v23_v0  ;;  %v35_v4 = vcombine.high %v24_v1, %v24_v1  ;;  %705 = vset.pattern.permute.xlu0 %v709_v5  ;;  %v26_v6 = vld [vmem:[%s1037_s3] sm:$0xff]  ;;  %v795_v40 = vld [vmem:[%s1040_s1 + $0x8] sm:$0xff]  ;;  %v818_v52 = vld [vmem:[%s1040_s1 + $0x10] sm:$0xff] }
   0x3   :  { %v25_v7 = vld [vmem:[%s1036_s2] sm:$0xff]  ;;  %29 = vperm.xlu0 %705, %v26_v6   ;;  %v787_v37 = vshrl.u32 %v368_v36, 7  ;;  %v789_v38 = vand.u32 127, %v368_v36 }
   0x4   :  { %685 = vmatprep.subr.msk.mxu0 %vm40_vm0, %v34_v3  ;;  %688 = vmatprep.subr.msk.mxu1 %vm40_vm0, %v35_v4  ;;  %v204_v8 = vld [vmem:[%s1038_s5] sm:$0xf]  ;;  %s710_s5 = smov 1  }
   0x5   :  { %686 = vmatpush1.msk.msra.mxu0 %vm40_vm0, %v23_v0  ;;  %689 = vmatpush1.msk.msra.mxu1 %vm40_vm0, %v24_v1  ;;  %v203_v24 = vld [vmem:[%s1039_s4] sm:$0xf]  ;;  %s711_s4 = smov 127   ;;  %v410_v39 = vsub.s32 1, %v787_v37  ;;  %v390_v42 = vsub.s32 0, %v787_v37  ;;  %vm370_vm7 = vcmp.lt.s32.totalorder %v789_v38, 1 }
   0x6   :  { %687 = vmatmul.mubr.msk.f32.vlgmr.msra.gmra.mxu0 %vm36_vm1, %v25_v7  ;;  %690 = vmatmul.mubr.msk.f32.vlgmr.msra.gmra.mxu1 %vm36_vm1, %v25_v7  ;;  %v804_v45 = vld [vmem:[%s1040_s1] sm:$0xff]  ;;  %s712_s1 = smov 16   ;;  %vm383_vm8 = vcmp.lt.s32.totalorder %v789_v38, 127  ;;  %vm484_vm9 = vcmp.lt.s32.totalorder %v789_v38, 16  ;;  %vm497_vm10 = vcmp.lt.s32.totalorder %v789_v38, 112 }
   0x7   :  { %207 = vperm.xlu0 %705, %v204_v8   ;;  %278 = vmatprep.mubr.f32.mxu0 %v708_v2  ;;  %v395_v43 = vrot.slane %v795_v40, %v390_v42  ;;  %v415_v44 = vrot.slane %v795_v40, %v410_v39  ;;  %v391_v50 = vrot.slane %v804_v45, %v390_v42  ;;  %v454_v8 = vsub.s32 3, %v787_v37 }
   0x8   :  { %349 = vmatprep.mubr.f32.mxu1 %v708_v2  ;;  %v403_v51 = vrot.slane %v809_v46, %v390_v42  ;;  %v411_v55 = vrot.slane %v804_v45, %v410_v39  ;;  %v423_v56 = vrot.slane %v809_v46, %v410_v39  ;;  %v419_v57 = vrot.slane %v818_v52, %v410_v39 }
   0x9   :  { %v399_v60 = vrot.slane %v818_v52, %v390_v42 }
  0x7e   :  { %v30_v9 = vpop.permute.xlu0 %29 }
  0x82   :  { %v208_v27 = vpop.permute.xlu0 %207 }
  0xc6   :  { %v115_v10 = vpop.f32.mrf.mxu0  ;;  %v186_v11 = vpop.f32.mrf.mxu1 }
  0xc7   :  { %v116_v12 = vadd.f32 %v115_v10, %v30_v9  ;;  %v187_v13 = vadd.f32 %v186_v11, %v30_v9 }
  0xc8   :  { %v117_v14 = vpop.f32.mrf.mxu0  ;;  %v188_v15 = vpop.f32.mrf.mxu1 }
  0xc9   :  { %v118_v16 = vadd.f32 %v117_v14, %v30_v9  ;;  %v189_v17 = vadd.f32 %v188_v15, %v30_v9  ;;  %vm191_vm2 = vcmp.gt.f32.partialorder %v116_v12, 0.0  ;;  %v195_v18 = vmul.f32 0.1, %v116_v12 }
  0xca   :  { %vm193_vm3 = vcmp.gt.f32.partialorder %v187_v13, 0.0  ;;  %v197_v19 = vmul.f32 0.1, %v187_v13  ;;  %v459_v14 = vrot.slane %v795_v40, %v454_v8 }
  0xcb   :  { %v196_v20 = vmul.f32 0.1, %v118_v16  ;;  %v198_v21 = vmul.f32 0.1, %v189_v17  ;;  %vm192_vm4 = vcmp.gt.f32.partialorder %v118_v16, 0.0  ;;  %vm194_vm5 = vcmp.gt.f32.partialorder %v189_v17, 0.0 }
  0xcc   :  { %v199_v25 = vsel %vm191_vm2, %v116_v12, %v195_v18  ;;  %v201_v26 = vsel %vm193_vm3, %v187_v13, %v197_v19  ;;  %v434_v13 = vsub.s32 2, %v787_v37  ;;  %v455_v18 = vrot.slane %v804_v45, %v454_v8 }
  0xcd   :  { %v200_v22 = vsel %vm192_vm4, %v118_v16, %v196_v20  ;;  %v202_v23 = vsel %vm194_vm5, %v189_v17, %v198_v21  ;;  %v467_v20 = vrot.slane %v809_v46, %v454_v8 }
  0xce   :  { %244 = vmatprep.subr.mxu0 %v200_v22  ;;  %315 = vmatprep.subr.mxu1 %v202_v23  ;;  %v439_v16 = vrot.slane %v795_v40, %v434_v13  ;;  %v435_v23 = vrot.slane %v804_v45, %v434_v13 }
  0xcf   :  { %245 = vmatpush1.msra.mxu0 %v199_v25  ;;  %316 = vmatpush1.msra.mxu1 %v201_v26  ;;  %v447_v25 = vrot.slane %v809_v46, %v434_v13 }
  0xd0   :  { %691 = vmatmul.mubr.msk.f32.vlgmr.msra.gmra.mxu0 %vm210_vm6, %v203_v24  ;;  %692 = vmatmul.mubr.msk.f32.vlgmr.msra.gmra.mxu1 %vm210_vm6, %v203_v24 }
 0x190   :  { %v280_v28 = vpop.f32.mrf.mxu0  ;;  %v351_v29 = vpop.f32.mrf.mxu1 }
 0x191   :  { %v771_v30 = vadd.f32 %v280_v28, %v208_v27  ;;  %v773_v31 = vadd.f32 %v351_v29, %v208_v27  ;;  %v463_v28 = vrot.slane %v818_v52, %v454_v8  ;;  %v568_v8 = vsub.s32 7, %v787_v37 }
 0x192   :  { %v282_v32 = vpop.f32.mrf.mxu0  ;;  %v353_v34 = vpop.f32.mrf.mxu1 }
 0x193   :  { %364 = vrot.lane.b32.xlu0 %v773_v31, %s710_s5  ;;  %360 = vrot.lane.b32.xlu1 %v771_v30, %s710_s5  ;;  %v777_v33 = vadd.f32 %v282_v32, %v208_v27  ;;  %v781_v35 = vadd.f32 %v353_v34, %v208_v27  ;;  %v404_v2 = vmul.f32 %v391_v50, %v771_v30 }
 0x194   :  { %v406_v10 = vmul.f32 %v399_v60, %v773_v31  ;;  %v448_v34 = vmul.f32 %v435_v23, %v771_v30 }
 0x195   :  { %v405_v53 = vmul.f32 %v395_v43, %v777_v33  ;;  %v407_v1 = vmul.f32 %v403_v51, %v781_v35  ;;  %v449_v24 = vmul.f32 %v439_v16, %v777_v33  ;;  %v451_v36 = vmul.f32 %v447_v25, %v781_v35 }
 0x197   :  { %375 = vrot.lane.b32.xlu0 %v771_v30, %s711_s4  ;;  %362 = vrot.lane.b32.xlu1 %v777_v33, %s710_s5 }
 0x19b   :  { %379 = vrot.lane.b32.xlu0 %v773_v31, %s711_s4  ;;  %366 = vrot.lane.b32.xlu1 %v781_v35, %s710_s5 }
 0x19f   :  { %377 = vrot.lane.b32.xlu1 %v777_v33, %s711_s4  ;;  %v443_v33 = vrot.slane %v818_v52, %v434_v13 }
 0x1a1   :  { %v450_v43 = vmul.f32 %v443_v33, %v773_v31  ;;  %v504_v31 = vsub.s32 4, %v787_v37 }
 0x1a3   :  { %381 = vrot.lane.b32.xlu1 %v781_v35, %s711_s4  ;;  %v524_v35 = vsub.s32 5, %v787_v37 }
 0x1a5   :  { %v918_v50 = vrot.slane %v795_v40, %v524_v35  ;;  %v934_v60 = vrot.slane %v809_v46, %v524_v35 }
 0x205   :  { %v361_v41 = vpop.permute.xlu1 %360  ;;  %v365_v47 = vpop.permute.xlu0 %364 }
 0x209   :  { %v363_v48 = vpop.permute.xlu1 %362  ;;  %v376_v0 = vpop.permute.xlu0 %375 }
 0x20a   :  { %v373_v49 = vsel %vm370_vm7, %v361_v41, %v363_v48  ;;  %v372_v61 = vsel %vm370_vm7, %v363_v48, %v365_v47  ;;  %v912_v48 = vrot.slane %v804_v45, %v504_v31 }
 0x20b   :  { %v425_v54 = vmul.f32 %v415_v44, %v373_v49  ;;  %v426_v5 = vmul.f32 %v419_v57, %v372_v61  ;;  %v915_v49 = vrot.slane %v804_v45, %v524_v35 }
 0x20d   :  { %v824_v58 = vadd.f32 %v425_v54, %v405_v53  ;;  %v367_v59 = vpop.permute.xlu1 %366  ;;  %v848_v11 = vadd.f32 %v426_v5, %v406_v10  ;;  %v380_v12 = vpop.permute.xlu0 %379  ;;  %v921_v54 = vrot.slane %v818_v52, %v504_v31 }
 0x20e   :  { %v371_v62 = vsel %vm370_vm7, %v365_v47, %v367_v59  ;;  %v374_v63 = vsel %vm370_vm7, %v367_v59, %v361_v41  ;;  %v908_v47 = vrot.slane %v795_v40, %v504_v31  ;;  %v931_v59 = vrot.slane %v818_v52, %v524_v35 }
 0x20f   :  { %v424_v3 = vmul.f32 %v411_v55, %v374_v63  ;;  %v427_v4 = vmul.f32 %v423_v56, %v371_v62  ;;  %478 = vrot.lane.b32.xlu1 %v824_v58, %s712_s1  ;;  %v924_v55 = vrot.slane %v809_v46, %v504_v31 }
 0x210   :  { %v519_v61 = vmul.f32 %v908_v47, %v824_v58 }
 0x211   :  { %v837_v6 = vadd.f32 %v424_v3, %v404_v2  ;;  %v839_v7 = vadd.f32 %v427_v4, %v407_v1  ;;  %v378_v9 = vpop.permute.xlu1 %377  ;;  %v548_v1 = vsub.s32 6, %v787_v37 }
 0x212   :  { %v385_v15 = vsel %vm383_vm8, %v378_v9, %v380_v12  ;;  %v386_v21 = vsel %vm383_vm8, %v376_v0, %v378_v9  ;;  %v520_v9 = vmul.f32 %v921_v54, %v848_v11 }
 0x213   :  { %482 = vrot.lane.b32.xlu1 %v839_v7, %s712_s1  ;;  %476 = vrot.lane.b32.xlu0 %v837_v6, %s712_s1  ;;  %v469_v19 = vmul.f32 %v459_v14, %v385_v15  ;;  %v468_v26 = vmul.f32 %v455_v18, %v386_v21  ;;  %v518_v62 = vmul.f32 %v912_v48, %v837_v6 }
 0x214   :  { %v521_v14 = vmul.f32 %v924_v55, %v839_v7  ;;  %v956_v37 = vrot.slane %v795_v40, %v548_v1  ;;  %v581_v21 = vrot.slane %v809_v46, %v568_v8  ;;  %v549_v23 = vrot.slane %v804_v45, %v548_v1 }
 0x215   :  { %v382_v17 = vpop.permute.xlu1 %381  ;;  %v872_v27 = vadd.f32 %v469_v19, %v449_v24  ;;  %v884_v39 = vadd.f32 %v468_v26, %v448_v34  ;;  %v557_v26 = vrot.slane %v818_v52, %v548_v1  ;;  %v577_v34 = vrot.slane %v818_v52, %v568_v8 }
 0x216   :  { %v387_v22 = vsel %vm383_vm8, %v382_v17, %v376_v0  ;;  %v384_v32 = vsel %vm383_vm8, %v380_v12, %v382_v17  ;;  %v562_v35 = vmul.f32 %v549_v23, %v837_v6 }
 0x217   :  { %491 = vrot.lane.b32.xlu1 %v824_v58, %s713_s14  ;;  %480 = vrot.lane.b32.xlu0 %v848_v11, %s712_s1  ;;  %v471_v29 = vmul.f32 %v467_v20, %v387_v22  ;;  %v470_v41 = vmul.f32 %v463_v28, %v384_v32  ;;  %v569_v20 = vrot.slane %v804_v45, %v568_v8 }
 0x218   :  { %v573_v32 = vrot.slane %v795_v40, %v568_v8  ;;  %v564_v31 = vmul.f32 %v557_v26, %v848_v11 }
 0x219   :  { %v886_v42 = vadd.f32 %v471_v29, %v451_v36  ;;  %v893_v30 = vadd.f32 %v470_v41, %v450_v43  ;;  %v561_v29 = vrot.slane %v809_v46, %v548_v1  ;;  %v563_v43 = vmul.f32 %v956_v37, %v824_v58 }
 0x21b   :  { %495 = vrot.lane.b32.xlu1 %v839_v7, %s713_s14  ;;  %489 = vrot.lane.b32.xlu0 %v837_v6, %s713_s14  ;;  %v565_v52 = vmul.f32 %v561_v29, %v839_v7  ;;  %v616_v8 = vmul.f32 %v921_v54, %v893_v30 }
 0x21f   :  { %592 = vrot.lane.b32.xlu1 %v872_v27, %s712_s1  ;;  %493 = vrot.lane.b32.xlu0 %v848_v11, %s713_s14  ;;  %v614_v11 = vmul.f32 %v912_v48, %v884_v39 }
 0x223   :  { %596 = vrot.lane.b32.xlu1 %v886_v42, %s712_s1  ;;  %590 = vrot.lane.b32.xlu0 %v884_v39, %s712_s1 }
 0x227   :  { %604 = vrot.lane.b32.xlu1 %v872_v27, %s713_s14  ;;  %594 = vrot.lane.b32.xlu0 %v893_v30, %s712_s1 }
 0x22b   :  { %608 = vrot.lane.b32.xlu1 %v886_v42, %s713_s14  ;;  %602 = vrot.lane.b32.xlu0 %v884_v39, %s713_s14 }
 0x22f   :  { %606 = vrot.lane.b32.xlu0 %v893_v30, %s713_s14 }
 0x281   :  { %v479_v44 = vpop.permute.xlu1 %478 }
 0x285   :  { %v483_v51 = vpop.permute.xlu1 %482  ;;  %v477_v53 = vpop.permute.xlu0 %476 }
 0x286   :  { %v487_v56 = vsel %vm484_vm9, %v477_v53, %v479_v44  ;;  %v488_v57 = vsel %vm484_vm9, %v483_v51, %v477_v53 }
 0x287   :  { %v538_v63 = vmul.f32 %v915_v49, %v488_v57  ;;  %v539_v0 = vmul.f32 %v918_v50, %v487_v56 }
 0x289   :  { %v542_v2 = vadd.f32 %v538_v63, %v518_v62  ;;  %v543_v3 = vadd.f32 %v539_v0, %v519_v61  ;;  %v492_v4 = vpop.permute.xlu1 %491  ;;  %v481_v5 = vpop.permute.xlu0 %480  ;;  %v615_v63 = vmul.f32 %v908_v47, %v872_v27 }
 0x28a   :  { %v485_v10 = vsel %vm484_vm9, %v481_v5, %v483_v51  ;;  %v486_v12 = vsel %vm484_vm9, %v479_v44, %v481_v5 }
 0x28b   :  { %v642_v13 = vcombine.low %v542_v2, %v543_v3  ;;  %v540_v15 = vmul.f32 %v931_v59, %v486_v12  ;;  %v541_v16 = vmul.f32 %v934_v60, %v485_v10  ;;  %v617_v10 = vmul.f32 %v924_v55, %v886_v42 }
 0x28d   :  { %646 = vst [vmem:[%s1041_s6] sm:$0xff] %v642_v13  ;;  %v544_v17 = vadd.f32 %v540_v15, %v520_v9  ;;  %v545_v18 = vadd.f32 %v541_v16, %v521_v14  ;;  %v496_v19 = vpop.permute.xlu1 %495  ;;  %v490_v22 = vpop.permute.xlu0 %489 }
 0x28e   :  { %v500_v24 = vsel %vm497_vm10, %v490_v22, %v492_v4  ;;  %v501_v25 = vsel %vm497_vm10, %v496_v19, %v490_v22  ;;  %v626_v22 = vmul.f32 %v549_v23, %v884_v39 }
 0x28f   :  { %v643_v28 = vcombine.low %v544_v17, %v545_v18  ;;  %v582_v45 = vmul.f32 %v569_v20, %v500_v24  ;;  %v585_v33 = vmul.f32 %v581_v21, %v501_v25  ;;  %v627_v24 = vmul.f32 %v956_v37, %v872_v27 }
 0x291   :  { %647 = vst [vmem:[%s1041_s6 + $0x8] sm:$0xff] %v643_v28  ;;  %v593_v36 = vpop.permute.xlu1 %592  ;;  %v494_v41 = vpop.permute.xlu0 %493  ;;  %v586_v53 = vadd.f32 %v582_v45, %v562_v35  ;;  %v589_v56 = vadd.f32 %v585_v33, %v565_v52  ;;  %v629_v45 = vmul.f32 %v561_v29, %v886_v42  ;;  %v628_v33 = vmul.f32 %v557_v26, %v893_v30 }
 0x292   :  { %v498_v46 = vsel %vm497_vm10, %v494_v41, %v496_v19  ;;  %v499_v40 = vsel %vm497_vm10, %v492_v4, %v494_v41 }
 0x293   :  { %v583_v44 = vmul.f32 %v573_v32, %v499_v40  ;;  %v584_v51 = vmul.f32 %v577_v34, %v498_v46 }
 0x295   :  { %v587_v57 = vadd.f32 %v583_v44, %v563_v43  ;;  %v588_v61 = vadd.f32 %v584_v51, %v564_v31  ;;  %v597_v62 = vpop.permute.xlu1 %596  ;;  %v591_v58 = vpop.permute.xlu0 %590 }
 0x296   :  { %v600_v0 = vsel %vm484_vm9, %v591_v58, %v593_v36  ;;  %v601_v6 = vsel %vm484_vm9, %v597_v62, %v591_v58 }
 0x297   :  { %v663_v7 = vcombine.low %v586_v53, %v587_v57  ;;  %v664_v1 = vcombine.low %v588_v61, %v589_v56  ;;  %v618_v2 = vmul.f32 %v601_v6, %v915_v49  ;;  %v619_v3 = vmul.f32 %v600_v0, %v918_v50 }
 0x299   :  { %695 = vst [vmem:[%s1041_s6 + $0x20] sm:$0xff] %v663_v7  ;;  %696 = vst [vmem:[%s1041_s6 + $0x28] sm:$0xff] %v664_v1  ;;  %v622_v47 = vadd.f32 %v618_v2, %v614_v11  ;;  %v623_v48 = vadd.f32 %v619_v3, %v615_v63  ;;  %v605_v4 = vpop.permute.xlu1 %604  ;;  %v595_v5 = vpop.permute.xlu0 %594 }
 0x29a   :  { %v598_v49 = vsel %vm484_vm9, %v595_v5, %v597_v62  ;;  %v599_v50 = vsel %vm484_vm9, %v593_v36, %v595_v5 }
 0x29b   :  { %v652_v9 = vcombine.low %v622_v47, %v623_v48  ;;  %v620_v12 = vmul.f32 %v599_v50, %v931_v59  ;;  %v621_v13 = vmul.f32 %v598_v49, %v934_v60 }
 0x29d   :  { %693 = vst [vmem:[%s1041_s6 + $0x10] sm:$0xff] %v652_v9  ;;  %v624_v14 = vadd.f32 %v620_v12, %v616_v8  ;;  %v625_v54 = vadd.f32 %v621_v13, %v617_v10  ;;  %v609_v15 = vpop.permute.xlu1 %608  ;;  %v603_v16 = vpop.permute.xlu0 %602 }
 0x29e   :  { %v612_v17 = vsel %vm497_vm10, %v603_v16, %v605_v4  ;;  %v613_v18 = vsel %vm497_vm10, %v609_v15, %v603_v16 }
 0x29f   :  { %v653_v19 = vcombine.low %v624_v14, %v625_v54  ;;  %v630_v55 = vmul.f32 %v612_v17, %v569_v20  ;;  %v633_v59 = vmul.f32 %v613_v18, %v581_v21 }
 0x2a1   :  { %694 = vst [vmem:[%s1041_s6 + $0x18] sm:$0xff] %v653_v19  ;;  %v607_v60 = vpop.permute.xlu0 %606  ;;  %v634_v20 = vadd.f32 %v630_v55, %v626_v22  ;;  %v637_v21 = vadd.f32 %v633_v59, %v629_v45 }
 0x2a2   :  { %v610_v25 = vsel %vm497_vm10, %v607_v60, %v609_v15  ;;  %v611_v28 = vsel %vm497_vm10, %v605_v4, %v607_v60 }
 0x2a3   :  { %v631_v36 = vmul.f32 %v611_v28, %v573_v32  ;;  %v632_v41 = vmul.f32 %v610_v25, %v577_v34 }
 0x2a5   :  { %v635_v43 = vadd.f32 %v631_v36, %v627_v24  ;;  %v636_v31 = vadd.f32 %v632_v41, %v628_v33 }
 0x2a7   :  { %v674_v39 = vcombine.low %v634_v20, %v635_v43  ;;  %v675_v23 = vcombine.low %v636_v31, %v637_v21 }
 0x2a9   :  { %697 = vst [vmem:[%s1041_s6 + $0x30] sm:$0xff] %v674_v39  ;;  %698 = vst [vmem:[%s1041_s6 + $0x38] sm:$0xff] %v675_v23 }

</bundles_post_ra>
